<compile_context>
chip_gen: v5e
topology: v5e:2x2
jax: 0.10.0
libtpu: 0.0.40
codegen_flags: <defaults>
</compile_context>

<pallas_src>
import functools
import math

import jax
import jax.numpy as jnp
from jax import lax
from jax.experimental import pallas as pl
from jax.experimental.pallas import tpu as pltpu


def _round_up(x, m):
    return ((x + m - 1) // m) * m


def _wcl2_denom_kernel(zr_ref, zc_ref, out_ref, *, correction):
    """One (row_tile, col_tile) grid step.

    zr_ref : (tm, Dp) bf16  row slab of  sqrt(1/T) * normalize([emb_i; emb_j])
    zc_ref : (tk, Dp) bf16  column slab of the same matrix
    out_ref: (tm, 1)  f32   per-row log(denominator); doubles as the
                            accumulator across the column (reduction) axis.
    """
    k = pl.program_id(1)
    nk = pl.num_programs(1)

    @pl.when(k == 0)
    def _():
        out_ref[...] = jnp.zeros_like(out_ref)

    # (z_r*sqrt(1/T)) . (z_c*sqrt(1/T))^T == sim / temperature.  Contract dim 1
    # of both operands (no transpose); bf16 in, f32 accumulate on the MXU.
    s = lax.dot_general(zr_ref[...], zc_ref[...],
                        dimension_numbers=(((1,), (1,)), ((), ())),
                        preferred_element_type=jnp.float32)        # (tm, tk)
    out_ref[...] += jnp.sum(jnp.exp(s), axis=1, keepdims=True)

    @pl.when(k == nk - 1)
    def _():
        # Remove self column (exp(1/T) for every valid row) and zero-padded
        # columns (exp(0)=1 each) with one constant.  Padded rows produce
        # garbage here; they are sliced away in the wrapper.
        denom = out_ref[...] - correction
        out_ref[...] = jnp.log(jnp.maximum(denom, 1e-30))


def weighted_contrastive_loss2(emb_i, emb_j, temperature=0.5):
    """Pallas implementation of WeightedContrastiveLoss2.forward."""
    B, D = emb_i.shape
    assert emb_j.shape == (B, D)
    N = 2 * B
    temperature = float(temperature)

    # ---- O(N*D) prologue in plain JAX (hoisted out of the kernel grid) -----
    def normalize(x):                              # F.normalize(dim=1), eps 1e-12
        x = x.astype(jnp.float32)
        n = jnp.sqrt(jnp.sum(x * x, axis=1, keepdims=True))
        return x / jnp.maximum(n, 1e-12)

    z_i = normalize(emb_i)
    z_j = normalize(emb_j)
    rep = jnp.concatenate([z_i, z_j], axis=0)      # (N, D), unit rows, f32

    # Weighted positives: sim_ij = d = cos(z_i, z_j), weight = 1 - d.
    d = jnp.sum(z_i * z_j, axis=1)                 # (B,)
    pos_over_temp = jnp.concatenate([d * (1.0 - d)] * 2, axis=0) / temperature

    # ---- tiling -------------------------------------------------------------
    Dp = max(128, _round_up(D, 128))               # lane-aligned feature dim

    # Square tile target; shrink for very wide Dp so double-buffered bf16
    # slabs + f32 (tm,tk) intermediates stay < ~20 MiB (v7x: 64 MiB physical /
    # 32 MiB scoped-default VMEM per TensorCore).
    if Dp <= 2048:
        t_target = 512
    elif Dp <= 4096:
        t_target = 256
    else:
        t_target = 128

    if N <= t_target:
        tm = _round_up(N, 8)
        Np = tm
    else:
        tm = t_target
        Np = _round_up(N, tm)                      # Np/tm >= 2 -> both v7x TCs busy

    # Keep the whole column operand resident in VMEM when it is small
    # (constant block index -> fetched once; no re-streaming per row tile).
    if Np <= 1024 and Np * Dp * 2 <= 4 * 1024 * 1024:
        tk = Np
    else:
        tk = tm

    ni, nk = Np // tm, Np // tk

    # ---- padded, normalized, temperature-folded bf16 operand ----------------
    # Folding sqrt(1/T) into z makes the MXU output equal sim/T directly.
    scale = math.sqrt(1.0 / temperature)
    z = jnp.zeros((Np, Dp), jnp.bfloat16)
    z = z.at[:N, :D].set((rep * scale).astype(jnp.bfloat16))

    correction = math.exp(1.0 / temperature) + float(Np - N)

    kernel = functools.partial(_wcl2_denom_kernel, correction=correction)
    col_passes = 1 if tk == Np else ni

    log_denom = pl.pallas_call(
        kernel,
        out_shape=jax.ShapeDtypeStruct((Np, 1), jnp.float32),
        grid_spec=pltpu.PrefetchScalarGridSpec(
            num_scalar_prefetch=0,
            grid=(ni, nk),
            in_specs=[
                pl.BlockSpec((tm, Dp), lambda i, k: (i, 0)),   # row slab
                pl.BlockSpec((tk, Dp), lambda i, k: (k, 0)),   # col slab
            ],
            out_specs=pl.BlockSpec((tm, 1), lambda i, k: (i, 0)),
        ),
        compiler_params=pltpu.CompilerParams(
            dimension_semantics=("parallel", "arbitrary")),
        cost_estimate=pl.CostEstimate(
            flops=2 * Np * Np * Dp,
            transcendentals=Np * Np,
            bytes_accessed=(1 + col_passes) * Np * Dp * 2 + Np * 4),
    )(z, z)

    # ---- O(N) epilogue -------------------------------------------------------
    loss_partial = log_denom[:N, 0] - pos_over_temp   # = -log(nominator/denominator)
    return jnp.sum(loss_partial) / float(N)


def _reference_loss(emb_i, emb_j, temperature=0.5):
    """Pure-JAX (f32) reference mirroring the PyTorch module."""
    B = emb_i.shape[0]

    def normalize(x):
        n = jnp.linalg.norm(x, axis=1, keepdims=True)
        return x / jnp.maximum(n, 1e-12)

    z_i = normalize(emb_i)
    z_j = normalize(emb_j)
    rep = jnp.concatenate([z_i, z_j], axis=0)
    sim = rep @ rep.T
    sim_ij = jnp.diagonal(sim, offset=B)
    sim_ji = jnp.diagonal(sim, offset=-B)
    w_ij = 1.0 - jnp.sum(z_i * z_j, axis=1)
    w_ji = 1.0 - jnp.sum(z_j * z_i, axis=1)
    positives = jnp.concatenate([sim_ij * w_ij, sim_ji * w_ji], axis=0)
    nominator = jnp.exp(positives / temperature)
    neg_mask = 1.0 - jnp.eye(2 * B)
    denominator = jnp.sum(neg_mask * jnp.exp(sim / temperature), axis=1)
    loss_partial = -jnp.log(nominator / denominator)
    return jnp.sum(loss_partial) / (2.0 * B)


if __name__ == "__main__":
    # Module __init__: batch_size, temperature=0.5 (registered buffers).
    batch_size = 8
    hidden = 32
    temperature = 0.5

    key = jax.random.PRNGKey(0)
    ki, kj = jax.random.split(key)
    emb_i = jax.random.normal(ki, (batch_size, hidden), dtype=jnp.float32)
    emb_j = jax.random.normal(kj, (batch_size, hidden), dtype=jnp.float32)

    loss = weighted_contrastive_loss2(emb_i, emb_j, temperature)
    loss = jax.block_until_ready(loss)

    ref = _reference_loss(emb_i, emb_j, temperature)
    # bf16 MXU operands (f32 accumulation) => ~1e-3 level error vs f32 reference.
    assert jnp.allclose(loss, ref, rtol=2e-2, atol=2e-2), (loss, ref)

    print("KERNEL_OK")
</pallas_src>

<mosaic_0001>
module attributes {stable_mosaic.version = 11 : i64} {
  func.func @_wcl2_denom_kernel(%arg0: i32, %arg1: i32, %arg2: memref<16x128xbf16, #tpu.memory_space<vmem>>, %arg3: memref<16x128xbf16, #tpu.memory_space<vmem>>, %arg4: memref<16x1xf32, #tpu.memory_space<vmem>>) attributes {dimension_semantics = [#tpu.dimension_semantics<parallel>, #tpu.dimension_semantics<arbitrary>], iteration_bounds = array<i64: 1, 1>, scalar_prefetch = 0 : i64, scratch_operands = 0 : i64, tpu.core_type = #tpu.core_type<tc>, window_params = [{transform_indices = @transform_0, window_bounds = array<i64: 16, 128>}, {transform_indices = @transform_1, window_bounds = array<i64: 16, 128>}, {transform_indices = @transform_2, window_bounds = array<i64: 16, 1>}]} {
    %c0_i32 = arith.constant 0 : i32
    %0 = arith.cmpi eq, %arg1, %c0_i32 : i32
    %1 = arith.extui %0 : i1 to i32
    %c0_i32_0 = arith.constant 0 : i32
    %2 = arith.cmpi ne, %1, %c0_i32_0 : i32
    scf.if %2 {
      %cst_11 = arith.constant 0.000000e+00 : f32
      %15 = vector.broadcast %cst_11 : f32 to vector<16x1xf32>
      %c0_12 = arith.constant 0 : index
      %c0_13 = arith.constant 0 : index
      %16 = vector.load %arg4[%c0_12, %c0_13] : memref<16x1xf32, #tpu.memory_space<vmem>>, vector<16x1xf32>
      tpu.vector_store %arg4[%c0_12, %c0_13], %15 {strides = array<i32>} : memref<16x1xf32, #tpu.memory_space<vmem>>, vector<16x1xf32>,
    } else {
    }
    %c0 = arith.constant 0 : index
    %c0_1 = arith.constant 0 : index
    %3 = vector.load %arg2[%c0, %c0_1] : memref<16x128xbf16, #tpu.memory_space<vmem>>, vector<16x128xbf16>
    %c0_2 = arith.constant 0 : index
    %c0_3 = arith.constant 0 : index
    %4 = vector.load %arg3[%c0_2, %c0_3] : memref<16x128xbf16, #tpu.memory_space<vmem>>, vector<16x128xbf16>
    %cst = arith.constant dense<0.000000e+00> : vector<16x16xf32>
    %5 = tpu.matmul %3, %4, %cst {dimension_numbers = #tpu.dot_dimension_numbers<[1], [1], [0], [0], [0, 0, 1, 0], [], []>} : vector<16x128xbf16>, vector<16x128xbf16>, vector<16x16xf32> -> vector<16x16xf32>
    %c0_4 = arith.constant 0 : index
    %c0_5 = arith.constant 0 : index
    %6 = vector.load %arg4[%c0_4, %c0_5] : memref<16x1xf32, #tpu.memory_space<vmem>>, vector<16x1xf32>
    %7 = math.exp %5 : vector<16x16xf32>
    %cst_6 = arith.constant dense<0.000000e+00> : vector<16xf32>
    %8 = vector.multi_reduction <add>, %7, %cst_6 [1] : vector<16x16xf32> to vector<16xf32>
    %9 = vector.shape_cast %8 : vector<16xf32> to vector<16x1xf32>
    %10 = arith.addf %6, %9 : vector<16x1xf32>
    %c0_7 = arith.constant 0 : index
    %c0_8 = arith.constant 0 : index
    %11 = vector.load %arg4[%c0_7, %c0_8] : memref<16x1xf32, #tpu.memory_space<vmem>>, vector<16x1xf32>
    tpu.vector_store %arg4[%c0_7, %c0_8], %10 {strides = array<i32>} : memref<16x1xf32, #tpu.memory_space<vmem>>, vector<16x1xf32>,
    %c0_i32_9 = arith.constant 0 : i32
    %12 = arith.cmpi eq, %arg1, %c0_i32_9 : i32
    %13 = arith.extui %12 : i1 to i32
    %c0_i32_10 = arith.constant 0 : i32
    %14 = arith.cmpi ne, %13, %c0_i32_10 : i32
    scf.if %14 {
      %c0_11 = arith.constant 0 : index
      %c0_12 = arith.constant 0 : index
      %15 = vector.load %arg4[%c0_11, %c0_12] : memref<16x1xf32, #tpu.memory_space<vmem>>, vector<16x1xf32>
      %cst_13 = arith.constant 7.3890562 : f32
      %16 = vector.broadcast %cst_13 : f32 to vector<16x1xf32>
      %17 = arith.subf %15, %16 : vector<16x1xf32>
      %cst_14 = arith.constant 1.000000e-30 : f32
      %18 = vector.broadcast %cst_14 : f32 to vector<16x1xf32>
      %19 = arith.maximumf %17, %18 : vector<16x1xf32>
      %20 = math.log %19 : vector<16x1xf32>
      %c0_15 = arith.constant 0 : index
      %c0_16 = arith.constant 0 : index
      %21 = vector.load %arg4[%c0_15, %c0_16] : memref<16x1xf32, #tpu.memory_space<vmem>>, vector<16x1xf32>
      tpu.vector_store %arg4[%c0_15, %c0_16], %20 {strides = array<i32>} : memref<16x1xf32, #tpu.memory_space<vmem>>, vector<16x1xf32>,
    } else {
    }
    return
  }
  func.func @transform_0(%arg0: i32, %arg1: i32) -> (i32, i32) {
    %c0_i32 = arith.constant 0 : i32
    %c0_i32_0 = arith.constant 0 : i32
    return %arg0, %c0_i32 : i32, i32
  }
  func.func @transform_1(%arg0: i32, %arg1: i32) -> (i32, i32) {
    %c0_i32 = arith.constant 0 : i32
    %c0_i32_0 = arith.constant 0 : i32
    return %arg1, %c0_i32 : i32, i32
  }
  func.func @transform_2(%arg0: i32, %arg1: i32) -> (i32, i32) {
    %c0_i32 = arith.constant 0 : i32
    %c0_i32_0 = arith.constant 0 : i32
    return %arg0, %c0_i32 : i32, i32
  }
}

</mosaic_0001>

<bundles_post_ra>
// kernel: tpu_custom_call.1
= control target key start
LH: loop header
LB: loop body
LE: loop exit
PB: predicated region body
PF: predicated region fallthrough
CT: control target
= control target key end

     0   :  { %7 = vsyncpa [#allocation3], 0  ;;  %s259_s0 = inlined_call_operand.hbm [shape: bf16[16,128], index: 0, kind: input, shape index: {}]   ;;  %s260_s1 = inlined_call_operand.hbm [shape: bf16[16,128], index: 1, kind: input, shape index: {}]   ;;  %s261_s2 = inlined_call_operand.vmem [shape: f32[16,1], index: 2, kind: output, shape index: {}]  }
   0x1   :  { %s13_s11 = sshll.u32 %s259_s0, 4  ;;  %s14_s11 = int_to_ptr.hbm [resolvable:$true] %s13_s11 }
   0x2   :  { %8 = vsyncpa [#allocation5], 0  ;;  %s197_s12 = smov [#allocation2]   ;;  %s26_s16 = sshll.u32 %s260_s1, 4  ;;  %s27_s16 = int_to_ptr.hbm [resolvable:$true] %s26_s16 }
   0x3   :  { %s15_s13 = sshll.u32 %s197_s12, 4  ;;  %s198_s17 = smov 64   ;;  %s16_s13 = int_to_ptr.vmem [resolvable:$true] %s15_s13 }
   0x4   :  { %s199_s18 = smov 4   ;;  %s200_s19 = smov [#allocation4]  }
   0x5   :  { %21 = dma.hbm_to_vmem [thread:$0]  %s14_s11, 128, %s16_s13, [#allocation3], %s198_s17, %s198_s17, %s199_s18  }
   0x6   :  { %s28_s20 = sshll.u32 %s200_s19, 4  ;;  %s29_s20 = int_to_ptr.vmem [resolvable:$true] %s28_s20 }
   0x7   :  { %34 = dma.hbm_to_vmem [thread:$0]  %s27_s16, 128, %s29_s20, [#allocation5], %s198_s17, %s198_s17, %s199_s18  }
   0x8   :  { %193 = dma.done.wait [#allocation3], 128  }
   0x9   :  { %194 = vsyncadd [#allocation3], 4294967168 }
   0xa   :  { %195 = dma.done.wait [#allocation5], 128  }
   0xb   :  { %196 = vsyncadd [#allocation5], 4294967168  ;;  %v131_v0 = vld [vmem:[#allocation4] sm:$0xff]  ;;  %v130_v1 = vld [vmem:[#allocation2] sm:$0xff]  ;;  %vm48_vm0 = vcmask 7168   ;;  %v201_v2 = vmov 0.0  }
   0xc   :  { %74 = vmatpush.bf16.xpose.msra.mxu0 %v131_v0  ;;  %49 = vst.msk [vmem:[%s261_s2] sm:$0xff] %vm48_vm0, %v201_v2  ;;  %vm87_vm1 = vcmask 130048  }
   0xd   :  { %50 = vst.msk [vmem:[%s261_s2 + $0x8] sm:$0xff] %vm48_vm0, %v201_v2 }
  0x13   :  { %75 = vmatmul.bf16.vlgmr.msra.gmra.mxu0 %v130_v1  ;;  %v81_v11 = vld [vmem:[%s261_s2] sm:$0xff] }
  0x14   :  { %v82_v14 = vld [vmem:[%s261_s2 + $0x8] sm:$0xff] }
  0x90   :  { %v76_v3 = vpop.f32.mrf.mxu0 }
  0x91   :  { %v83_v4 = vmul.f32 1.442695, %v76_v3 }
  0x93   :  { %137 = vpow2.f32 %v83_v4 }
  0x98   :  { %v78_v5 = vpop.f32.mrf.mxu0 }
  0x99   :  { %v138_v6 = vpop.eup %137  ;;  %v85_v7 = vmul.f32 1.442695, %v78_v5 }
  0x9a   :  { %v88_v8 = vsel %vm87_vm1, %v138_v6, 0.0 }
  0x9b   :  { %139 = vpow2.f32 %v85_v7  ;;  %89 = vadd.xlane.f32.xlu0 %v88_v8 }
  0xa1   :  { %v140_v9 = vpop.eup %139 }
  0xa2   :  { %v91_v10 = vsel %vm87_vm1, %v140_v9, 0.0 }
  0xa3   :  { %92 = vadd.xlane.f32.xlu0 %v91_v10 }
 0x10e   :  { %v90_v12 = vpop.xlane.xlu0 %89 }
 0x10f   :  { %v94_v13 = vadd.f32 %v90_v12, %v81_v11 }
 0x111   :  { %97 = vst.msk [vmem:[%s261_s2] sm:$0xff] %vm48_vm0, %v94_v13 }
 0x116   :  { %v93_v15 = vpop.xlane.xlu0 %92 }
 0x117   :  { %v95_v16 = vadd.f32 %v93_v15, %v82_v14 }
 0x118   :  { %v102_v17 = vld [vmem:[%s261_s2] sm:$0xff] }
 0x119   :  { %v128_v18 = vadd.f32 -7.389056, %v102_v17  ;;  %98 = vst.msk [vmem:[%s261_s2 + $0x8] sm:$0xff] %vm48_vm0, %v95_v16 }
 0x11b   :  { %v106_v19 = vmax.f32 %v128_v18, 1e-30 }
 0x11d   :  { %141 = vlog2.f32 %v106_v19 }
 0x120   :  { %v103_v20 = vld [vmem:[%s261_s2 + $0x8] sm:$0xff] }
 0x121   :  { %v129_v21 = vadd.f32 -7.389056, %v103_v20 }
 0x123   :  { %v142_v22 = vpop.eup %141  ;;  %v107_v23 = vmax.f32 %v129_v21, 1e-30 }
 0x124   :  { %v109_v24 = vmul.f32 0.6931472, %v142_v22 }
 0x125   :  { %143 = vlog2.f32 %v107_v23 }
 0x126   :  { %112 = vst.msk [vmem:[%s261_s2] sm:$0xff] %vm48_vm0, %v109_v24 }
 0x12b   :  { %v144_v25 = vpop.eup %143 }
 0x12c   :  { %v111_v26 = vmul.f32 0.6931472, %v144_v25 }
 0x12e   :  { %113 = vst.msk [vmem:[%s261_s2 + $0x8] sm:$0xff] %vm48_vm0, %v111_v26 }
 0x12f   :  { %118 = vsyncpa [#allocation3], 1 }
 0x130   :  { %119 = vsyncpa [#allocation5], 1 }

</bundles_post_ra>
